<compile_context>
chip_gen: v7x
topology: tpu7x:2x2x1
jax: 0.10.0
libtpu: 0.0.40
codegen_flags: <defaults>
</compile_context>

<pallas_src>
import functools

import jax
import jax.numpy as jnp
from jax.experimental import pallas as pl
from jax.experimental.pallas import tpu as pltpu

# ----------------------------- sizes -----------------------------------------
B = 8          # batch
D = 4          # num_domains
E = 32         # per-domain embedding dim
S = 8          # sequence length per domain (backbone stub only)
V = 64         # vocab size (backbone stub only)
C = 128        # codebook size per domain
MID_DIMS = [D * E, 64]   # MidDims: Linear(128,64) -> ReLU -> Dropout -> Linear(64,2)
OUT_DIM = 2              # OutDim (gender logits)
OUT_PAD = 128            # lane-dense padded width of the MLP head output
H_PAD = 128              # hidden dim padded 64 -> 128 (lane/K dense on the MXU)

_VMEM = pl.BlockSpec(memory_space=pltpu.MemorySpace.VMEM)


# ----------------------------- fused Pallas kernel ----------------------------
def _gender_fused_kernel(org_ref, rec_ref, book_ref, w1_ref, b1_ref,
                         w2_ref, b2_ref, out_ref, *, use_recover):
    # org, rec: (B, D*E)   book: (D, E, C)
    # w1: (D*E, H_PAD)  b1: (1, H_PAD)  w2: (H_PAD, OUT_PAD)  b2: (1, OUT_PAD)
    # out: (B, OUT_PAD + D*C) merged lane-dense slab
    org = org_ref[...]
    rec = rec_ref[...]

    # --- MLP head: Linear -> ReLU -> Dropout(eval: identity) -> Linear -------
    x = rec if use_recover else org
    h = jnp.dot(x, w1_ref[...], preferred_element_type=jnp.float32) + b1_ref[...]
    h = jnp.maximum(h, 0.0)                                   # ReLU
    y = jnp.dot(h, w2_ref[...], preferred_element_type=jnp.float32) + b2_ref[...]

    # --- diff = mean((org.detach() - recover)^2), packed into spare lane -----
    # (forward value only; detach/no-grad semantics would need a custom_vjp)
    dlt = org - rec
    diff = jnp.mean(dlt * dlt)
    col = jax.lax.broadcasted_iota(jnp.int32, y.shape, 1)
    y = jnp.where(col == OUT_DIM, diff, y)                    # column OUT_DIM carries diff

    out_ref[:, :OUT_PAD] = y.astype(out_ref.dtype)            # unmasked 128-wide store

    # --- per-domain codebook logits: D small lane-dense MXU dots -------------
    nb = rec.shape[0]
    rec3 = rec.reshape(nb, D, E)
    for dom in range(D):                                      # D=4, unrolled
        lg = jnp.dot(rec3[:, dom, :], book_ref[dom],
                     preferred_element_type=jnp.float32)      # (B, C)
        out_ref[:, OUT_PAD + dom * C:OUT_PAD + (dom + 1) * C] = lg.astype(out_ref.dtype)


def _gender_fused(org_flat, rec_flat, codebook, w1p, b1p, w2p, b2p, *, use_recover):
    b = org_flat.shape[0]
    nd, _, c = codebook.shape
    # Gridless, fully VMEM-resident: total working set < 1 MiB, fits trivially
    # on v5e/v6e/v7x.  (If B is ever scaled up, tile over B with
    # dimension_semantics=("parallel",) to use both v7x TensorCores.)
    return pl.pallas_call(
        functools.partial(_gender_fused_kernel, use_recover=use_recover),
        out_shape=jax.ShapeDtypeStruct((b, OUT_PAD + nd * c), jnp.float32),
        in_specs=[_VMEM] * 7,
        out_specs=_VMEM,
    )(org_flat, rec_flat, codebook, w1p, b1p, w2p, b2p)


# ----------------------------- one-time param prep (init, not per-call) ------
def prepare_head_params(w1, b1, w2, b2):
    """Pad the MLP head weights to lane/K-dense shapes ONCE at init time."""
    h = w1.shape[1]
    w1p = jnp.pad(w1, ((0, 0), (0, H_PAD - h)))                       # (D*E, 128)
    b1p = jnp.pad(b1, ((0, 0), (0, H_PAD - h)))                       # (1, 128)
    w2p = jnp.pad(w2, ((0, H_PAD - h), (0, OUT_PAD - w2.shape[1])))   # (128, 128)
    b2p = jnp.pad(b2, ((0, 0), (0, OUT_PAD - b2.shape[1])))           # (1, 128)
    return w1p, b1p, w2p, b2p


# ----------------------------- backbone stub (plain JAX glue) ----------------
def ummd_stub(data, mask, embed_table, w_rec, codebook):
    """Deterministic stand-in for UMMD_MLM.ummd_model(None, data, mask).

    data: (B, D, S) int32 token ids, mask: (B, D, S) {0,1} float32.
    Returns embeddings_recover, embeddings_org: (B, D, E); embed_ids: (B, D) int32.
    """
    nd = embed_table.shape[0]
    gathered = embed_table[jnp.arange(nd)[None, :, None], data]         # (B, D, S, E)
    m = mask[..., None]
    denom = jnp.maximum(jnp.sum(m, axis=2), 1.0)
    embeddings_org = jnp.sum(gathered * m, axis=2) / denom              # (B, D, E)
    embeddings_recover = jnp.einsum("bde,def->bdf", embeddings_org, w_rec)
    scores = jnp.einsum("bde,dec->bdc", embeddings_org, codebook)
    embed_ids = jnp.argmax(scores, axis=-1).astype(jnp.int32)           # (B, D)
    return embeddings_recover, embeddings_org, embed_ids


# ----------------------------- Gender.forward (single jit) -------------------
@functools.partial(jax.jit, static_argnames="tune_strategy")
def gender_forward(data, mask, backbone_params, head_params, tune_strategy="origin"):
    embed_table, w_rec, codebook = backbone_params
    w1p, b1p, w2p, b2p = head_params

    embeddings_recover, embeddings_org, embed_ids = ummd_stub(
        data, mask, embed_table, w_rec, codebook
    )

    b = embeddings_org.shape[0]
    nd, e, c = codebook.shape

    org_flat = embeddings_org.reshape(b, nd * e)        # (B, D*E)
    rec_flat = embeddings_recover.reshape(b, nd * e)    # (B, D*E)

    use_recover = (tune_strategy == "recover")          # 'origin'/other -> origin path

    slab = _gender_fused(org_flat, rec_flat, codebook, w1p, b1p, w2p, b2p,
                         use_recover=use_recover)       # (B, OUT_PAD + D*C)

    x = slab[:, :OUT_DIM]                               # (B, OutDim)
    diff = slab[0, OUT_DIM]                             # packed scalar
    logits = slab[:, OUT_PAD:].reshape(b, nd, c)        # (B, D, C) == torch.stack(., 1)
    return x, logits, embed_ids, diff


# ----------------------------- main ------------------------------------------
if __name__ == "__main__":
    key = jax.random.PRNGKey(0)
    k_emb, k_rec, k_book, k_w1, k_b1, k_w2, k_b2, k_data, k_mask = jax.random.split(key, 9)

    # deterministic synthetic parameters
    embed_table = jax.random.normal(k_emb, (D, V, E), jnp.float32) * 0.1
    w_rec = jax.random.normal(k_rec, (D, E, E), jnp.float32) * 0.1
    codebook = jax.random.normal(k_book, (D, E, C), jnp.float32) * 0.1
    w1 = jax.random.normal(k_w1, (MID_DIMS[0], MID_DIMS[1]), jnp.float32) * 0.05
    b1 = jax.random.normal(k_b1, (1, MID_DIMS[1]), jnp.float32) * 0.01
    w2 = jax.random.normal(k_w2, (MID_DIMS[1], OUT_DIM), jnp.float32) * 0.05
    b2 = jax.random.normal(k_b2, (1, OUT_DIM), jnp.float32) * 0.01

    backbone_params = (embed_table, w_rec, codebook)
    # constant prep hoisted out of the per-call path: pad once at init
    head_params = prepare_head_params(w1, b1, w2, b2)
    head_params = jax.block_until_ready(head_params)

    # deterministic example inputs
    data = jax.random.randint(k_data, (B, D, S), 0, V, dtype=jnp.int32)
    mask = (jax.random.uniform(k_mask, (B, D, S)) > 0.2).astype(jnp.float32)

    x, logits, embed_ids, diff = gender_forward(
        data, mask, backbone_params, head_params, tune_strategy="origin"
    )
    jax.block_until_ready((x, logits, embed_ids, diff))

    assert x.shape == (B, OUT_DIM)
    assert logits.shape == (B, D, C)
    assert embed_ids.shape == (B, D)
    assert diff.shape == ()
    assert bool(jnp.isfinite(x).all())
    assert bool(jnp.isfinite(logits).all())
    assert bool(jnp.isfinite(diff))

    # quick self-check of the fused head against plain-JAX reference math
    emb_rec, emb_org, _ = ummd_stub(data, mask, embed_table, w_rec, codebook)
    xr = emb_org.reshape(B, -1)
    ref_x = jnp.maximum(xr @ w1 + b1, 0.0) @ w2 + b2
    ref_logits = jnp.einsum("bde,dec->bdc", emb_rec, codebook)
    ref_diff = jnp.mean((emb_org - emb_rec) ** 2)
    assert bool(jnp.allclose(x, ref_x, atol=1e-4, rtol=1e-4))
    assert bool(jnp.allclose(logits, ref_logits, atol=1e-4, rtol=1e-4))
    assert bool(jnp.allclose(diff, ref_diff, atol=1e-5, rtol=1e-4))

    print("KERNEL_OK")
</pallas_src>

<mosaic_0001>
module attributes {stable_mosaic.version = 11 : i64} {
  func.func @_gender_fused_kernel(%arg0: memref<8x128xf32, #tpu.memory_space<vmem>>, %arg1: memref<8x128xf32, #tpu.memory_space<vmem>>, %arg2: memref<4x32x128xf32, #tpu.memory_space<vmem>>, %arg3: memref<128x128xf32, #tpu.memory_space<vmem>>, %arg4: memref<1x128xf32, #tpu.memory_space<vmem>>, %arg5: memref<128x128xf32, #tpu.memory_space<vmem>>, %arg6: memref<1x128xf32, #tpu.memory_space<vmem>>, %arg7: memref<8x640xf32, #tpu.memory_space<vmem>>) attributes {dimension_semantics = [], scalar_prefetch = 0 : i64, scratch_operands = 0 : i64, tpu.core_type = #tpu.core_type<tc>} {
    %c0 = arith.constant 0 : index
    %c0_0 = arith.constant 0 : index
    %0 = vector.load %arg0[%c0, %c0_0] : memref<8x128xf32, #tpu.memory_space<vmem>>, vector<8x128xf32>
    %c0_1 = arith.constant 0 : index
    %c0_2 = arith.constant 0 : index
    %1 = vector.load %arg1[%c0_1, %c0_2] : memref<8x128xf32, #tpu.memory_space<vmem>>, vector<8x128xf32>
    %c0_3 = arith.constant 0 : index
    %c0_4 = arith.constant 0 : index
    %2 = vector.load %arg3[%c0_3, %c0_4] : memref<128x128xf32, #tpu.memory_space<vmem>>, vector<128x128xf32>
    %cst = arith.constant dense<0.000000e+00> : vector<8x128xf32>
    %3 = tpu.matmul %0, %2, %cst {dimension_numbers = #tpu.dot_dimension_numbers<[1], [0], [0], [1], [0, 0, 1, 1], [], []>} : vector<8x128xf32>, vector<128x128xf32>, vector<8x128xf32> -> vector<8x128xf32>
    %c0_5 = arith.constant 0 : index
    %c0_6 = arith.constant 0 : index
    %4 = vector.load %arg4[%c0_5, %c0_6] : memref<1x128xf32, #tpu.memory_space<vmem>>, vector<1x128xf32>
    %5 = vector.broadcast %4 : vector<1x128xf32> to vector<8x128xf32>
    %6 = arith.addf %3, %5 : vector<8x128xf32>
    %cst_7 = arith.constant 0.000000e+00 : f32
    %7 = vector.broadcast %cst_7 : f32 to vector<8x128xf32>
    %8 = arith.maximumf %6, %7 : vector<8x128xf32>
    %c0_8 = arith.constant 0 : index
    %c0_9 = arith.constant 0 : index
    %9 = vector.load %arg5[%c0_8, %c0_9] : memref<128x128xf32, #tpu.memory_space<vmem>>, vector<128x128xf32>
    %cst_10 = arith.constant dense<0.000000e+00> : vector<8x128xf32>
    %10 = tpu.matmul %8, %9, %cst_10 {dimension_numbers = #tpu.dot_dimension_numbers<[1], [0], [0], [1], [0, 0, 1, 1], [], []>} : vector<8x128xf32>, vector<128x128xf32>, vector<8x128xf32> -> vector<8x128xf32>
    %c0_11 = arith.constant 0 : index
    %c0_12 = arith.constant 0 : index
    %11 = vector.load %arg6[%c0_11, %c0_12] : memref<1x128xf32, #tpu.memory_space<vmem>>, vector<1x128xf32>
    %12 = vector.broadcast %11 : vector<1x128xf32> to vector<8x128xf32>
    %13 = arith.addf %10, %12 : vector<8x128xf32>
    %14 = arith.subf %0, %1 : vector<8x128xf32>
    %15 = arith.mulf %14, %14 : vector<8x128xf32>
    %16 = vector.shape_cast %15 : vector<8x128xf32> to vector<1x8x128xf32>
    %cst_13 = arith.constant dense<0.000000e+00> : vector<1xf32>
    %17 = vector.multi_reduction <add>, %16, %cst_13 [1, 2] : vector<1x8x128xf32> to vector<1xf32>
    %18 = vector.shape_cast %17 : vector<1xf32> to vector<1x1x1xf32>
    %19 = vector.extract %18[0, 0, 0] : f32 from vector<1x1x1xf32>
    %cst_14 = arith.constant 1.024000e+03 : f32
    %20 = arith.divf %19, %cst_14 : f32
    %21 = tpu.iota {dimensions = array<i32: 1>} : vector<8x128xi32>
    %c2_i32 = arith.constant 2 : i32
    %22 = vector.broadcast %c2_i32 : i32 to vector<8x128xi32>
    %23 = arith.cmpi eq, %21, %22 : vector<8x128xi32>
    %24 = vector.broadcast %20 : f32 to vector<8x128xf32>
    %25 = arith.select %23, %24, %13 : vector<8x128xi1>, vector<8x128xf32>
    %c0_15 = arith.constant 0 : index
    %c0_16 = arith.constant 0 : index
    %26 = vector.load %arg7[%c0_15, %c0_16] : memref<8x640xf32, #tpu.memory_space<vmem>>, vector<8x128xf32>
    tpu.vector_store %arg7[%c0_15, %c0_16], %25 {strides = array<i32>} : memref<8x640xf32, #tpu.memory_space<vmem>>, vector<8x128xf32>,
    %27 = vector.shape_cast %1 : vector<8x128xf32> to vector<8x4x32xf32>
    %28 = vector.extract_strided_slice %27 {offsets = [0, 0, 0], sizes = [8, 1, 32], strides = [1, 1, 1]} : vector<8x4x32xf32> to vector<8x1x32xf32>
    %29 = vector.shape_cast %28 : vector<8x1x32xf32> to vector<8x32xf32>
    %c0_17 = arith.constant 0 : index
    %c0_18 = arith.constant 0 : index
    %c0_19 = arith.constant 0 : index
    %30 = vector.load %arg2[%c0_17, %c0_18, %c0_19] : memref<4x32x128xf32, #tpu.memory_space<vmem>>, vector<1x32x128xf32>
    %31 = vector.shape_cast %30 : vector<1x32x128xf32> to vector<32x128xf32>
    %cst_20 = arith.constant dense<0.000000e+00> : vector<8x128xf32>
    %32 = tpu.matmul %29, %31, %cst_20 {dimension_numbers = #tpu.dot_dimension_numbers<[1], [0], [0], [1], [0, 0, 1, 1], [], []>} : vector<8x32xf32>, vector<32x128xf32>, vector<8x128xf32> -> vector<8x128xf32>
    %c0_21 = arith.constant 0 : index
    %c128 = arith.constant 128 : index
    %33 = vector.load %arg7[%c0_21, %c128] : memref<8x640xf32, #tpu.memory_space<vmem>>, vector<8x128xf32>
    tpu.vector_store %arg7[%c0_21, %c128], %32 {strides = array<i32>} : memref<8x640xf32, #tpu.memory_space<vmem>>, vector<8x128xf32>,
    %34 = vector.extract_strided_slice %27 {offsets = [0, 1, 0], sizes = [8, 1, 32], strides = [1, 1, 1]} : vector<8x4x32xf32> to vector<8x1x32xf32>
    %35 = vector.shape_cast %34 : vector<8x1x32xf32> to vector<8x32xf32>
    %c1 = arith.constant 1 : index
    %c0_22 = arith.constant 0 : index
    %c0_23 = arith.constant 0 : index
    %36 = vector.load %arg2[%c1, %c0_22, %c0_23] : memref<4x32x128xf32, #tpu.memory_space<vmem>>, vector<1x32x128xf32>
    %37 = vector.shape_cast %36 : vector<1x32x128xf32> to vector<32x128xf32>
    %cst_24 = arith.constant dense<0.000000e+00> : vector<8x128xf32>
    %38 = tpu.matmul %35, %37, %cst_24 {dimension_numbers = #tpu.dot_dimension_numbers<[1], [0], [0], [1], [0, 0, 1, 1], [], []>} : vector<8x32xf32>, vector<32x128xf32>, vector<8x128xf32> -> vector<8x128xf32>
    %c0_25 = arith.constant 0 : index
    %c256 = arith.constant 256 : index
    %39 = vector.load %arg7[%c0_25, %c256] : memref<8x640xf32, #tpu.memory_space<vmem>>, vector<8x128xf32>
    tpu.vector_store %arg7[%c0_25, %c256], %38 {strides = array<i32>} : memref<8x640xf32, #tpu.memory_space<vmem>>, vector<8x128xf32>,
    %40 = vector.extract_strided_slice %27 {offsets = [0, 2, 0], sizes = [8, 1, 32], strides = [1, 1, 1]} : vector<8x4x32xf32> to vector<8x1x32xf32>
    %41 = vector.shape_cast %40 : vector<8x1x32xf32> to vector<8x32xf32>
    %c2 = arith.constant 2 : index
    %c0_26 = arith.constant 0 : index
    %c0_27 = arith.constant 0 : index
    %42 = vector.load %arg2[%c2, %c0_26, %c0_27] : memref<4x32x128xf32, #tpu.memory_space<vmem>>, vector<1x32x128xf32>
    %43 = vector.shape_cast %42 : vector<1x32x128xf32> to vector<32x128xf32>
    %cst_28 = arith.constant dense<0.000000e+00> : vector<8x128xf32>
    %44 = tpu.matmul %41, %43, %cst_28 {dimension_numbers = #tpu.dot_dimension_numbers<[1], [0], [0], [1], [0, 0, 1, 1], [], []>} : vector<8x32xf32>, vector<32x128xf32>, vector<8x128xf32> -> vector<8x128xf32>
    %c0_29 = arith.constant 0 : index
    %c384 = arith.constant 384 : index
    %45 = vector.load %arg7[%c0_29, %c384] : memref<8x640xf32, #tpu.memory_space<vmem>>, vector<8x128xf32>
    tpu.vector_store %arg7[%c0_29, %c384], %44 {strides = array<i32>} : memref<8x640xf32, #tpu.memory_space<vmem>>, vector<8x128xf32>,
    %46 = vector.extract_strided_slice %27 {offsets = [0, 3, 0], sizes = [8, 1, 32], strides = [1, 1, 1]} : vector<8x4x32xf32> to vector<8x1x32xf32>
    %47 = vector.shape_cast %46 : vector<8x1x32xf32> to vector<8x32xf32>
    %c3 = arith.constant 3 : index
    %c0_30 = arith.constant 0 : index
    %c0_31 = arith.constant 0 : index
    %48 = vector.load %arg2[%c3, %c0_30, %c0_31] : memref<4x32x128xf32, #tpu.memory_space<vmem>>, vector<1x32x128xf32>
    %49 = vector.shape_cast %48 : vector<1x32x128xf32> to vector<32x128xf32>
    %cst_32 = arith.constant dense<0.000000e+00> : vector<8x128xf32>
    %50 = tpu.matmul %47, %49, %cst_32 {dimension_numbers = #tpu.dot_dimension_numbers<[1], [0], [0], [1], [0, 0, 1, 1], [], []>} : vector<8x32xf32>, vector<32x128xf32>, vector<8x128xf32> -> vector<8x128xf32>
    %c0_33 = arith.constant 0 : index
    %c512 = arith.constant 512 : index
    %51 = vector.load %arg7[%c0_33, %c512] : memref<8x640xf32, #tpu.memory_space<vmem>>, vector<8x128xf32>
    tpu.vector_store %arg7[%c0_33, %c512], %50 {strides = array<i32>} : memref<8x640xf32, #tpu.memory_space<vmem>>, vector<8x128xf32>,
    return
  }
}

</mosaic_0001>

<bundles_post_ra>
// kernel: gender_forward.1
= control target key start
LH: loop header
LB: loop body
LE: loop exit
PB: predicated region body
PF: predicated region fallthrough
CT: control target
= control target key end

     0   :  { %v968_v0 = vmov 0.0|0.0   ;;  %vm969_vm0 = vmmov 0   ;;  %v970_v4 = vmov 0.0   ;;  %s971_s15 = smov 96   ;;  %s972_s16 = smov 32   ;;  %v229_v55 = vlaneseq  ;;  %s1303_s3 = inlined_call_operand.vmem [shape: f32[128,128], index: 3, kind: input, shape index: {}]   ;;  %s1304_s1 = inlined_call_operand.vmem [shape: f32[8,128], index: 1, kind: input, shape index: {}]   ;;  %s1305_s5 = inlined_call_operand.vmem [shape: f32[128,128], index: 5, kind: input, shape index: {}]   ;;  %s1306_s2 = inlined_call_operand.vmem [shape: f32[4,32,128], index: 2, kind: input, shape index: {}]   ;;  %s1307_s0 = inlined_call_operand.vmem [shape: f32[8,128], index: 0, kind: input, shape index: {}]   ;;  %s1308_s4 = inlined_call_operand.vmem [shape: f32[1,128], index: 4, kind: input, shape index: {}]   ;;  %s1309_s7 = inlined_call_operand.vmem [shape: f32[8,640], index: 7, kind: output, shape index: {}]   ;;  %s1310_s6 = inlined_call_operand.vmem [shape: f32[1,128], index: 6, kind: input, shape index: {}]  }
   0x1   :  { %886 = vmatprep.subr.bf16.mxu0 %v968_v0  ;;  %v28_v1 = vld [vmem:[%s1303_s3] sm:$0xff]  ;;  %v29_v2 = vld [vmem:[%s1303_s3 + $0x8] sm:$0xff]  ;;  %v30_v3 = vld [vmem:[%s1303_s3 + $0x10] sm:$0xff]  ;;  %804 = vmatprep.mubr.msk.f32.mxu0 %vm969_vm0, %v970_v4  ;;  %s973_s28 = smov 64   ;;  %v974_v56 = vmov 1983009808  }
   0x2   :  { %v887_v5 = vpack.c.bf16 %v29_v2, %v28_v1  ;;  %v31_v6 = vld [vmem:[%s1303_s3 + $0x18] sm:$0xff]  ;;  %910 = vmatprep.subr.bf16.mxu1 %v968_v0  ;;  %839 = vmatprep.mubr.msk.f32.mxu1 %vm969_vm0, %v970_v4  ;;  %v32_v8 = vld [vmem:[%s1303_s3 + $0x20] sm:$0xff]  ;;  %v33_v9 = vld [vmem:[%s1303_s3 + $0x28] sm:$0xff]  ;;  %v248_v57 = vunpack.c.l.s4 %v974_v56  ;;  %v251_v62 = vshrl.u32 %v229_v55, 7  ;;  %v975_v63 = vmov 1934713408  }
   0x3   :  { %v890_v7 = vpack.c.bf16 %v31_v6, %v30_v3  ;;  %v1044_v10 = vld [vmem:[%s1304_s1] sm:$0xff]  ;;  %v123_v12 = vld [vmem:[%s1305_s5 + $0x8] sm:$0xff]  ;;  %v893_v13 = vpack.c.bf16 %v33_v9, %v32_v8  ;;  %v34_v15 = vld [vmem:[%s1303_s3 + $0x30] sm:$0xff]  ;;  %v280_v1 = vunpack.c.l.s4 %v975_v63  ;;  %vm326_vm1 = vcmask 1041409  }
   0x4   :  { %888 = vmatpush3.bf16.msra.mxu0 %v887_v5  ;;  %236 = vrot.lane.b32.xlu0 %v1044_v10, %s971_s15  ;;  %v122_v11 = vld [vmem:[%s1305_s5] sm:$0xff]  ;;  %v35_v16 = vld [vmem:[%s1303_s3 + $0x38] sm:$0xff]  ;;  %v124_v17 = vld [vmem:[%s1305_s5 + $0x10] sm:$0xff]  ;;  %v249_v61 = vunpack.c.0.s8 %v248_v57  ;;  %vm329_vm2 = vcmask 1042434   ;;  %vm332_vm3 = vcmask 1043459   ;;  %vm335_vm4 = vcmask 1044484  }
   0x5   :  { %889 = vmatprep.subr.bf16.mxu0 %v968_v0  ;;  %242 = vrot.lane.b32.xlu1 %v1044_v10, %s972_s16  ;;  %v911_v14 = vpack.c.bf16 %v123_v12, %v122_v11  ;;  %v125_v18 = vld [vmem:[%s1305_s5 + $0x18] sm:$0xff]  ;;  %v126_v20 = vld [vmem:[%s1305_s5 + $0x20] sm:$0xff]  ;;  %v127_v21 = vld [vmem:[%s1305_s5 + $0x28] sm:$0xff]  ;;  %v896_v22 = vpack.c.bf16 %v35_v16, %v34_v15  ;;  %v281_v8 = vunpack.c.0.s8 %v280_v1  ;;  %vm338_vm5 = vcmask 1045509  }
   0x6   :  { %v914_v19 = vpack.c.bf16 %v125_v18, %v124_v17  ;;  %v36_v23 = vld [vmem:[%s1303_s3 + $0x40] sm:$0xff]  ;;  %v37_v24 = vld [vmem:[%s1303_s3 + $0x48] sm:$0xff]  ;;  %v917_v25 = vpack.c.bf16 %v127_v21, %v126_v20  ;;  %v128_v26 = vld [vmem:[%s1305_s5 + $0x30] sm:$0xff]  ;;  %v252_v5 = vsub.s32 %v249_v61, %v251_v62  ;;  %vm341_vm6 = vcmask 1046534  }
   0x7   :  { %912 = vmatpush3.bf16.msra.mxu1 %v911_v14  ;;  %v129_v27 = vld [vmem:[%s1305_s5 + $0x38] sm:$0xff]  ;;  %v899_v28 = vpack.c.bf16 %v37_v24, %v36_v23  ;;  %v38_v29 = vld [vmem:[%s1303_s3 + $0x50] sm:$0xff]  ;;  %v130_v32 = vld [vmem:[%s1305_s5 + $0x40] sm:$0xff]  ;;  %v284_v16 = vsub.s32 %v281_v8, %v251_v62  ;;  %vm344_vm7 = vcmask 1047559   ;;  %vm346_vm8 = vcmask 261120  }
   0x8   :  { %891 = vmatpush3.bf16.msra.mxu0 %v890_v7  ;;  %239 = vrot.lane.b32.xlu0 %v1044_v10, %s973_s28  ;;  %v39_v30 = vld [vmem:[%s1303_s3 + $0x58] sm:$0xff]  ;;  %v920_v31 = vpack.c.bf16 %v129_v27, %v128_v26  ;;  %v131_v33 = vld [vmem:[%s1305_s5 + $0x48] sm:$0xff]  ;;  %v40_v35 = vld [vmem:[%s1303_s3 + $0x60] sm:$0xff] }
   0x9   :  { %892 = vmatprep.subr.bf16.mxu0 %v968_v0  ;;  %913 = vmatprep.subr.bf16.mxu1 %v968_v0  ;;  %v902_v34 = vpack.c.bf16 %v39_v30, %v38_v29  ;;  %v41_v36 = vld [vmem:[%s1303_s3 + $0x68] sm:$0xff]  ;;  %v923_v37 = vpack.c.bf16 %v131_v33, %v130_v32  ;;  %v132_v38 = vld [vmem:[%s1305_s5 + $0x50] sm:$0xff]  ;;  %v133_v39 = vld [vmem:[%s1305_s5 + $0x58] sm:$0xff] }
   0xa   :  { %v905_v40 = vpack.c.bf16 %v41_v36, %v40_v35  ;;  %v42_v41 = vld [vmem:[%s1303_s3 + $0x70] sm:$0xff]  ;;  %v43_v42 = vld [vmem:[%s1303_s3 + $0x78] sm:$0xff]  ;;  %v926_v43 = vpack.c.bf16 %v133_v39, %v132_v38  ;;  %v134_v44 = vld [vmem:[%s1305_s5 + $0x60] sm:$0xff] }
   0xb   :  { %915 = vmatpush3.bf16.msra.mxu1 %v914_v19  ;;  %v135_v45 = vld [vmem:[%s1305_s5 + $0x68] sm:$0xff]  ;;  %v908_v46 = vpack.c.bf16 %v43_v42, %v42_v41  ;;  %v313_v47 = vld [vmem:[%s1306_s2] sm:$0xff]  ;;  %v315_v52 = vld [vmem:[%s1306_s2 + $0x10] sm:$0xff] }
   0xc   :  { %894 = vmatpush3.bf16.msra.mxu0 %v893_v13  ;;  %916 = vmatprep.subr.bf16.mxu1 %v968_v0  ;;  %v314_v48 = vld [vmem:[%s1306_s2 + $0x8] sm:$0xff]  ;;  %v929_v49 = vpack.c.bf16 %v135_v45, %v134_v44  ;;  %v26_v50 = vld [vmem:[%s1307_s0] sm:$0xff]  ;;  %v316_v53 = vld [vmem:[%s1306_s2 + $0x18] sm:$0xff] }
   0xd   :  { %895 = vmatprep.subr.bf16.mxu0 %v968_v0  ;;  %v935_v51 = vpack.c.bf16 %v314_v48, %v313_v47  ;;  %v938_v54 = vpack.c.bf16 %v316_v53, %v315_v52  ;;  %v136_v58 = vld [vmem:[%s1305_s5 + $0x70] sm:$0xff]  ;;  %v137_v59 = vld [vmem:[%s1305_s5 + $0x78] sm:$0xff]  ;;  %v215_v15 = vsub.f32 %v26_v50, %v1044_v10 }
   0xe   :  { %v932_v60 = vpack.c.bf16 %v137_v59, %v136_v58 }
   0xf   :  { %918 = vmatpush3.bf16.msra.mxu1 %v917_v25  ;;  %v216_v19 = vmul.f32 %v215_v15, %v215_v15 }
  0x10   :  { %897 = vmatpush3.bf16.msra.mxu0 %v896_v22  ;;  %919 = vmatprep.subr.bf16.mxu1 %v968_v0 }
  0x11   :  { %898 = vmatprep.subr.bf16.mxu0 %v968_v0 }
  0x13   :  { %921 = vmatpush3.bf16.msra.mxu1 %v920_v31 }
  0x14   :  { %900 = vmatpush3.bf16.msra.mxu0 %v899_v28  ;;  %922 = vmatprep.subr.bf16.mxu1 %v968_v0  ;;  %v709_v28 = vld [vmem:[%s1306_s2 + $0x48] sm:$0xff] }
  0x15   :  { %901 = vmatprep.subr.bf16.mxu0 %v968_v0 }
  0x17   :  { %924 = vmatpush3.bf16.msra.mxu1 %v923_v37 }
  0x18   :  { %903 = vmatpush3.bf16.msra.mxu0 %v902_v34  ;;  %925 = vmatprep.subr.bf16.mxu1 %v968_v0 }
  0x19   :  { %904 = vmatprep.subr.bf16.mxu0 %v968_v0 }
  0x1b   :  { %927 = vmatpush3.bf16.msra.mxu1 %v926_v43 }
  0x1c   :  { %906 = vmatpush3.bf16.msra.mxu0 %v905_v40  ;;  %928 = vmatprep.subr.bf16.mxu1 %v968_v0 }
  0x1d   :  { %907 = vmatprep.subr.bf16.mxu0 %v968_v0 }
  0x1f   :  { %930 = vmatpush3.bf16.msra.mxu1 %v929_v49 }
  0x20   :  { %909 = vmatpush3.bf16.msra.mxu0 %v908_v46  ;;  %931 = vmatprep.subr.bf16.mxu1 %v968_v0 }
  0x21   :  { %934 = vmatprep.subr.bf16.mxu0 %v968_v0 }
  0x23   :  { %805 = vmatmul.mubr.f32.vlgmr.msra.gmra.mrb[0].mxu0 %v26_v50  ;;  %933 = vmatpush3.bf16.msra.mxu1 %v932_v60 }
  0x24   :  { %936 = vmatpush3.bf16.msra.mxu0 %v935_v51  ;;  %850 = vmatprep.mubr.msk.f32.mxu0 %vm969_vm0, %v970_v4 }
  0x25   :  { %937 = vmatprep.subr.bf16.mxu0 %v968_v0  ;;  %940 = vmatprep.subr.bf16.mxu1 %v968_v0 }
  0x28   :  { %939 = vmatpush3.bf16.msra.mxu0 %v938_v54 }
  0x29   :  { %946 = vmatprep.subr.bf16.mxu0 %v968_v0  ;;  %217 = vadd.xlane.f32.xlu1 %v216_v19 }
  0x76   :  { %v237_v2 = vpop.permute.xlu0 %236 }
  0x77   :  { %v243_v3 = vpop.permute.xlu1 %242 }
  0x78   :  { %v261_v6 = vcombine.low %v237_v2, %v243_v3  ;;  %v262_v7 = vcombine.high %v237_v2, %v243_v3  ;;  %v710_v3 = vld [vmem:[%s1306_s2 + $0x50] sm:$0xff] }
  0x7a   :  { %v240_v9 = vpop.permute.xlu0 %239  ;;  %v269_v11 = vrot.slane %v261_v6, %v252_v5  ;;  %v276_v12 = vrot.slane %v262_v7, %v252_v5 }
  0x7b   :  { %v245_v13 = vcombine.low %v1044_v10, %v240_v9  ;;  %v246_v14 = vcombine.high %v1044_v10, %v240_v9  ;;  %v708_v10 = vld [vmem:[%s1306_s2 + $0x40] sm:$0xff] }
  0x7c   :  { %v947_v35 = vpack.c.bf16 %v709_v28, %v708_v10 }
  0x7d   :  { %v253_v17 = vrot.slane %v245_v13, %v252_v5  ;;  %v260_v18 = vrot.slane %v246_v14, %v252_v5  ;;  %v711_v5 = vld [vmem:[%s1306_s2 + $0x58] sm:$0xff] }
  0x7f   :  { %v277_v20 = vcombine.low %v253_v17, %v269_v11  ;;  %v278_v21 = vcombine.high %v253_v17, %v269_v11  ;;  %v293_v22 = vcombine.low %v260_v18, %v276_v12  ;;  %v294_v23 = vcombine.high %v260_v18, %v276_v12 }
  0x81   :  { %v1165_v24 = vrot.slane %v277_v20, %v284_v16  ;;  %v1167_v25 = vrot.slane %v278_v21, %v284_v16  ;;  %v1169_v26 = vrot.slane %v293_v22, %v284_v16  ;;  %v1171_v27 = vrot.slane %v294_v23, %v284_v16 }
  0x82   :  { %v950_v16 = vpack.c.bf16 %v711_v5, %v710_v3 }
  0x83   :  { %v309_v29 = vcombine.high %v1165_v24, %v970_v4  ;;  %v310_v30 = vcombine.high %v1167_v25, %v970_v4  ;;  %v1185_v31 = vcombine.high %v1169_v26, %v970_v4  ;;  %v328_v32 = vrot.slane %v1167_v25, 6 }
  0x84   :  { %v425_v33 = vrot.slane %v1165_v24, 1  ;;  %v517_v34 = vrot.slane %v1165_v24, 2  ;;  %v427_v37 = vrot.slane %v1167_v25, 7  ;;  %v312_v38 = vcombine.high %v1171_v27, %v970_v4 }
  0x85   :  { %v325_v36 = vrot.slane %v309_v29, 7  ;;  %v331_v39 = vrot.slane %v310_v30, 5  ;;  %v609_v40 = vrot.slane %v1165_v24, 3  ;;  %v612_v41 = vrot.slane %v1167_v25, 1 }
  0x86   :  { %v334_v42 = vrot.slane %v1169_v26, 4  ;;  %v518_v43 = vrot.slane %v309_v29, 1  ;;  %v337_v45 = vrot.slane %v1185_v31, 3  ;;  %v521_v46 = vrot.slane %v310_v30, 7 }
  0x87   :  { %v327_v44 = vsel %vm326_vm1, %v325_v36, %v1165_v24  ;;  %v523_v47 = vrot.slane %v1169_v26, 6  ;;  %v340_v49 = vrot.slane %v1171_v27, 2  ;;  %v343_v50 = vrot.slane %v312_v38, 1 }
  0x88   :  { %v330_v48 = vsel %vm329_vm2, %v328_v32, %v327_v44  ;;  %v519_v51 = vsel %vm326_vm1, %v518_v43, %v517_v34  ;;  %v525_v54 = vrot.slane %v1185_v31, 5  ;;  %v426_v56 = vsel %vm326_vm1, %v309_v29, %v425_v33  ;;  %v704_v34 = vld [vmem:[%s1306_s2 + $0x28] sm:$0xff]  ;;  %v713_v43 = vld [vmem:[%s1306_s2 + $0x60] sm:$0xff] }
  0x89   :  { %v333_v52 = vsel %vm332_vm3, %v331_v39, %v330_v48  ;;  %v520_v53 = vsel %vm329_vm2, %v1167_v25, %v519_v51  ;;  %v428_v59 = vsel %vm329_vm2, %v427_v37, %v426_v56  ;;  %v429_v60 = vrot.slane %v310_v30, 6  ;;  %v714_v44 = vld [vmem:[%s1306_s2 + $0x68] sm:$0xff] }
  0x8a   :  { %v336_v57 = vsel %vm335_vm4, %v334_v42, %v333_v52  ;;  %v522_v58 = vsel %vm332_vm3, %v521_v46, %v520_v53  ;;  %v431_v63 = vrot.slane %v1169_v26, 5  ;;  %v433_v1 = vrot.slane %v1185_v31, 4  ;;  %v715_v46 = vld [vmem:[%s1306_s2 + $0x70] sm:$0xff] }
  0x8b   :  { %v339_v61 = vsel %vm338_vm5, %v337_v45, %v336_v57  ;;  %v524_v62 = vsel %vm335_vm4, %v523_v47, %v522_v58  ;;  %v527_v6 = vrot.slane %v1171_v27, 4  ;;  %v430_v7 = vsel %vm332_vm3, %v429_v60, %v428_v59  ;;  %v716_v47 = vld [vmem:[%s1306_s2 + $0x78] sm:$0xff]  ;;  %v701_v60 = vld [vmem:[%s1310_s6] ss:$0 sm:$0xff] }
  0x8c   :  { %v342_v2 = vsel %vm341_vm6, %v340_v49, %v339_v61  ;;  %v435_v8 = vrot.slane %v1171_v27, 3  ;;  %v526_v11 = vsel %vm338_vm5, %v525_v54, %v524_v62  ;;  %v432_v12 = vsel %vm335_vm4, %v431_v63, %v430_v7 }
  0x8d   :  { %v345_v9 = vsel %vm344_vm7, %v343_v50, %v342_v2  ;;  %v437_v13 = vrot.slane %v312_v38, 2  ;;  %v434_v14 = vsel %vm338_vm5, %v433_v1, %v432_v12  ;;  %v610_v15 = vrot.slane %v309_v29, 2 }
  0x8e   :  { %851 = vmatmul.mubr.msk.f32.vlgmr.msra.gmra.mrb[2].mxu0 %vm346_vm8, %v345_v9  ;;  %v529_v17 = vrot.slane %v312_v38, 3  ;;  %v436_v18 = vsel %vm341_vm6, %v435_v8, %v434_v14  ;;  %v615_v19 = vrot.slane %v1169_v26, 7  ;;  %v528_v20 = vsel %vm341_vm6, %v527_v6, %v526_v11 }
  0x8f   :  { %948 = vmatpush3.bf16.msra.mxu0 %v947_v35  ;;  %872 = vmatprep.mubr.msk.f32.mxu0 %vm969_vm0, %v970_v4  ;;  %v438_v21 = vsel %vm344_vm7, %v437_v13, %v436_v18  ;;  %v611_v22 = vsel %vm326_vm1, %v610_v15, %v609_v40  ;;  %v617_v23 = vrot.slane %v1185_v31, 6  ;;  %v619_v25 = vrot.slane %v1171_v27, 5  ;;  %v700_v27 = vld [vmem:[%s1308_s4] ss:$0 sm:$0xff]  ;;  %v705_v40 = vld [vmem:[%s1306_s2 + $0x30] sm:$0xff] }
  0x90   :  { %949 = vmatprep.subr.bf16.mxu0 %v968_v0  ;;  %v613_v24 = vsel %vm329_vm2, %v612_v41, %v611_v22  ;;  %v621_v28 = vrot.slane %v312_v38, 4  ;;  %v530_v26 = vsel %vm344_vm7, %v529_v17, %v528_v20  ;;  %v706_v41 = vld [vmem:[%s1306_s2 + $0x38] sm:$0xff]  ;;  %v953_v45 = vpack.c.bf16 %v714_v44, %v713_v43 }
  0x91   :  { %v614_v10 = vsel %vm332_vm3, %v310_v30, %v613_v24  ;;  %v703_v30 = vld [vmem:[%s1306_s2 + $0x20] sm:$0xff]  ;;  %v944_v42 = vpack.c.bf16 %v706_v41, %v705_v40  ;;  %v956_v48 = vpack.c.bf16 %v716_v47, %v715_v46  ;;  %v230_v59 = vand.u32 127, %v229_v55 }
  0x92   :  { %v616_v29 = vsel %vm335_vm4, %v615_v19, %v614_v10  ;;  %v941_v38 = vpack.c.bf16 %v704_v34, %v703_v30 }
  0x93   :  { %951 = vmatpush3.bf16.msra.mxu0 %v950_v16  ;;  %v618_v32 = vsel %vm338_vm5, %v617_v23, %v616_v29  ;;  %vm231_vm9 = vcmp.eq.s32.totalorder %v230_v59, 2 }
  0x94   :  { %v620_v33 = vsel %vm341_vm6, %v619_v25, %v618_v32 }
  0x95   :  { %v622_v31 = vsel %vm344_vm7, %v621_v28, %v620_v33 }
  0x96   :  { %873 = vmatmul.mubr.msk.f32.vlgmr.msra.gmra.mrb[4].mxu0 %vm346_vm8, %v530_v26 }
  0xb6   :  { %v218_v49 = vpop.xlane.xlu1 %217 }
  0xb7   :  { %v219_v50 = vrot.slane %v218_v49, 4 }
  0xb9   :  { %v220_v51 = vadd.f32 %v219_v50, %v218_v49 }
  0xbb   :  { %v221_v52 = vrot.slane %v220_v51, 2 }
  0xbd   :  { %v222_v53 = vadd.f32 %v221_v52, %v220_v51 }
  0xbf   :  { %v223_v54 = vrot.slane %v222_v53, 1 }
  0xc1   :  { %v224_v56 = vadd.f32 %v223_v54, %v222_v53 }
  0xc3   :  { %958 = vpush %v224_v56 }
  0xf4   :  { %s959_s29 = spop %958 }
  0xf5   :  { %s228_s30 = smul.f32 0.0009765625, %s959_s29 }
  0xf6   :  { %v117_v35 = vpop.f32.mrb[0].mxu0 }
  0xf7   :  { %v118_v36 = vadd.f32 %v700_v27, %v117_v35  ;;  %v806_v37 = vpop.f32.mrb[1].mxu0  ;;  %v232_v61 = vstv %s228_s30 }
  0xf9   :  { %v121_v39 = vmax.f32 %v118_v36, 0.0 }
  0xfb   :  { %840 = vmatmul.mubr.f32.vlgmr.msra.gmra.mrb[0].mxu1 %v121_v39 }
  0xfc   :  { %942 = vmatpush3.bf16.msra.mxu1 %v941_v38  ;;  %861 = vmatprep.mubr.msk.f32.mxu1 %vm969_vm0, %v970_v4 }
  0xfd   :  { %943 = vmatprep.subr.bf16.mxu1 %v968_v0 }
 0x100   :  { %945 = vmatpush3.bf16.msra.mxu1 %v944_v42 }
 0x101   :  { %952 = vmatprep.subr.bf16.mxu1 %v968_v0 }
 0x103   :  { %862 = vmatmul.mubr.msk.f32.vlgmr.msra.gmra.mrb[2].mxu1 %vm346_vm8, %v438_v21 }
 0x104   :  { %954 = vmatpush3.bf16.msra.mxu1 %v953_v45  ;;  %883 = vmatprep.mubr.msk.f32.mxu1 %vm969_vm0, %v970_v4 }
 0x105   :  { %955 = vmatprep.subr.bf16.mxu1 %v968_v0 }
 0x108   :  { %957 = vmatpush3.bf16.msra.mxu1 %v956_v48 }
 0x10b   :  { %884 = vmatmul.mubr.msk.f32.vlgmr.msra.gmra.mrb[4].mxu1 %vm346_vm8, %v622_v31 }
 0x161   :  { %v415_v57 = vpop.f32.mrb[2].mxu0 }
 0x162   :  { %419 = vst [vmem:[%s1309_s7 + $0x8] sm:$0xff] %v415_v57  ;;  %v852_v58 = vpop.f32.mrb[3].mxu0 }
 0x169   :  { %v599_v4 = vpop.f32.mrb[4].mxu0 }
 0x16a   :  { %603 = vst [vmem:[%s1309_s7 + $0x18] sm:$0xff] %v599_v4  ;;  %v874_v0 = vpop.f32.mrb[5].mxu0 }
 0x1ce   :  { %v211_v62 = vpop.f32.mrb[0].mxu1 }
 0x1cf   :  { %v212_v63 = vadd.f32 %v701_v60, %v211_v62  ;;  %v841_v1 = vpop.f32.mrb[1].mxu1 }
 0x1d1   :  { %v233_v2 = vsel %vm231_vm9, %v232_v61, %v212_v63 }
 0x1d2   :  { %234 = vst [vmem:[%s1309_s7] sm:$0xff] %v233_v2 }
 0x1d6   :  { %v507_v3 = vpop.f32.mrb[2].mxu1 }
 0x1d7   :  { %511 = vst [vmem:[%s1309_s7 + $0x10] sm:$0xff] %v507_v3  ;;  %v863_v55 = vpop.f32.mrb[3].mxu1 }
 0x1de   :  { %v691_v5 = vpop.f32.mrb[4].mxu1 }
 0x1df   :  { %695 = vst [vmem:[%s1309_s7 + $0x20] sm:$0xff] %v691_v5  ;;  %v885_v6 = vpop.f32.mrb[5].mxu1 }

</bundles_post_ra>
